<compile_context>
chip_gen: v7x
topology: tpu7x:2x2x1
jax: 0.10.0
libtpu: 0.0.40
codegen_flags: <defaults>
</compile_context>

<pallas_src>
import functools
import math

import jax
import jax.numpy as jnp
from jax import lax
from jax.experimental import pallas as pl
from jax.experimental.pallas import tpu as pltpu


def _round_up(x, m):
    return ((x + m - 1) // m) * m


# TODO(synk): get_quantization_bounds / l4q_init_scale are not defined in the
# provided source; standard symmetric bounds and max-abs/q_p init are used.
def get_quantization_bounds(n_bits: int):
    q_n = -(2 ** (n_bits - 1))
    q_p = 2 ** (n_bits - 1) - 1
    return float(q_n), float(q_p)


# ---------------------------------------------------------------------------
# Pallas kernel 1: w_q = round(clamp((w0 + alpha*lora_b@lora_a) * inv_s)) * s
#   - tiled over Cout rows; compact scale (tr, G) broadcast in-kernel.
#   - writes into a K_pad (multiple of 128) wide, padded output.
# ---------------------------------------------------------------------------
def _quant_weight_kernel(w0_ref, la_ref, lb_ref, s_ref, inv_ref, wq_ref,
                         *, alpha, q_n, q_p, gs_row):
    # LoRA delta for this row tile: (tr, r) @ (r, K) on the MXU.
    delta = jnp.dot(lb_ref[...], la_ref[...], preferred_element_type=jnp.float32)
    w_comb = w0_ref[...].astype(jnp.float32) + alpha * delta

    tr, k = w_comb.shape
    g = s_ref.shape[1]
    if g == 1:
        # One scale per row (covers per-filter groups / per-tensor scale).
        w_int = jnp.round(jnp.clip(w_comb * inv_ref[...], q_n, q_p))
        wq = w_int * s_ref[...]
    else:
        # gs_row consecutive columns share a scale (gs_row divides K).
        wc = w_comb.reshape(tr, g, gs_row)
        w_int = jnp.round(jnp.clip(wc * inv_ref[...][:, :, None], q_n, q_p))
        wq = (w_int * s_ref[...][:, :, None]).reshape(tr, k)

    wq = wq.astype(wq_ref.dtype)
    k_pad = wq_ref.shape[1]
    if k_pad == k:
        wq_ref[...] = wq
    else:
        # Zero the padded lanes, then store the valid prefix (masked store).
        wq_ref[...] = jnp.zeros_like(wq_ref)
        wq_ref[:, pl.ds(0, k)] = wq


def quantize_weight_pallas(w0_rows, lora_a, lora_b_rows, s_rows, inv_rows,
                           *, alpha, q_n, q_p, gs_row, k_pad, out_dtype, tr=128):
    c_pad, k = w0_rows.shape
    r = lora_a.shape[0]
    g = s_rows.shape[1]
    tr = min(tr, c_pad)
    assert c_pad % tr == 0

    kern = functools.partial(_quant_weight_kernel, alpha=alpha, q_n=q_n,
                             q_p=q_p, gs_row=gs_row)
    return pl.pallas_call(
        kern,
        out_shape=jax.ShapeDtypeStruct((c_pad, k_pad), out_dtype),
        grid=(c_pad // tr,),
        in_specs=[
            pl.BlockSpec((tr, k), lambda i: (i, 0)),     # w0 rows
            pl.BlockSpec((r, k), lambda i: (0, 0)),      # lora_a (shared)
            pl.BlockSpec((tr, r), lambda i: (i, 0)),     # lora_b rows
            pl.BlockSpec((tr, g), lambda i: (i, 0)),     # compact scale
            pl.BlockSpec((tr, g), lambda i: (i, 0)),     # compact 1/(scale+eps)
        ],
        out_specs=pl.BlockSpec((tr, k_pad), lambda i: (i, 0)),
        compiler_params=pltpu.CompilerParams(dimension_semantics=("parallel",)),
    )(w0_rows, lora_a, lora_b_rows, s_rows, inv_rows)


# ---------------------------------------------------------------------------
# Pallas kernel 2: conv as im2col matmul (+ bias), tiled over (M, Cout, K)
#   with an f32 VMEM accumulator.  Weight consumed in natural [Cout, K] layout.
# ---------------------------------------------------------------------------
def _conv_matmul_kernel(p_ref, w_ref, b_ref, o_ref, acc_ref):
    kk = pl.program_id(2)

    @pl.when(kk == 0)
    def _():
        acc_ref[...] = jnp.zeros_like(acc_ref)

    acc_ref[...] += lax.dot_general(
        p_ref[...], w_ref[...],
        dimension_numbers=(((1,), (1,)), ((), ())),
        preferred_element_type=jnp.float32)

    @pl.when(kk == pl.num_programs(2) - 1)
    def _():
        o_ref[...] = (acc_ref[...] + b_ref[...]).astype(o_ref.dtype)


def conv_matmul_pallas(patches, w_q, bias_row, out_dtype, tm, tn, tk):
    m_pad, k_pad = patches.shape
    c_pad = w_q.shape[0]
    grid = (m_pad // tm, c_pad // tn, k_pad // tk)
    return pl.pallas_call(
        _conv_matmul_kernel,
        out_shape=jax.ShapeDtypeStruct((m_pad, c_pad), out_dtype),
        grid_spec=pltpu.PrefetchScalarGridSpec(
            num_scalar_prefetch=0,
            grid=grid,
            in_specs=[
                pl.BlockSpec((tm, tk), lambda i, j, kk: (i, kk)),   # patches
                pl.BlockSpec((tn, tk), lambda i, j, kk: (j, kk)),   # w_q [Cout,K]
                pl.BlockSpec((1, tn), lambda i, j, kk: (0, j)),     # bias
            ],
            out_specs=pl.BlockSpec((tm, tn), lambda i, j, kk: (i, j)),
            scratch_shapes=[pltpu.VMEM((tm, tn), jnp.float32)],
        ),
        compiler_params=pltpu.CompilerParams(
            dimension_semantics=("parallel", "parallel", "arbitrary")),
    )(patches, w_q, bias_row)


# ---------------------------------------------------------------------------
# Glue: im2col from an NHWC view.  K ordering is (Cin, KH, KW), matching
# w0.reshape(Cout, Cin*KH*KW) row-major flattening.
# ---------------------------------------------------------------------------
def im2col_nhwc(x_nchw, kh, kw, stride, padding, dilation):
    n, c, h, w = x_nchw.shape
    sh, sw = stride
    ph, pw = padding
    dh, dw = dilation
    x = jnp.transpose(x_nchw, (0, 2, 3, 1))                 # NHWC, input-sized
    xp = jnp.pad(x, ((0, 0), (ph, ph), (pw, pw), (0, 0)))
    oh = (h + 2 * ph - dh * (kh - 1) - 1) // sh + 1
    ow = (w + 2 * pw - dw * (kw - 1) - 1) // sw + 1
    cols = []
    for i in range(kh):
        for j in range(kw):
            sl = xp[:, i * dh: i * dh + sh * (oh - 1) + 1: sh,
                       j * dw: j * dw + sw * (ow - 1) + 1: sw, :]   # (N,OH,OW,C)
            cols.append(sl)
    patches = jnp.stack(cols, axis=-1)                      # (N,OH,OW,C,KH*KW)
    patches = patches.reshape(n * oh * ow, c * kh * kw)     # K = (Cin,KH,KW)
    return patches, oh, ow


# ---------------------------------------------------------------------------
# Full forward (matches L4QQuantizedConv2dFunction.forward semantics)
# ---------------------------------------------------------------------------
def l4q_conv2d_forward(x, w0, lora_a, lora_b, bias, q_scale, *, alpha, n_bits,
                       quant_group_size, stride, padding, dilation, groups=1,
                       mxu_dtype=jnp.bfloat16, tm=256):
    assert groups == 1  # TODO(synk): grouped conv (groups > 1) not implemented
    stride = (stride, stride) if isinstance(stride, int) else tuple(stride)
    padding = (padding, padding) if isinstance(padding, int) else tuple(padding)
    dilation = (dilation, dilation) if isinstance(dilation, int) else tuple(dilation)

    c_out, cin_g, kh, kw = w0.shape
    k = cin_g * kh * kw
    numel = c_out * k
    w0_flat = w0.reshape(c_out, k).astype(jnp.float32)
    q_n, q_p = get_quantization_bounds(n_bits)

    # --- effective group-size logic (mirrors the torch forward) ---
    eff_gs = quant_group_size
    if quant_group_size != -1:
        if numel == 0 or numel < quant_group_size or numel % quant_group_size != 0:
            eff_gs = -1
    q_scale_f = q_scale.astype(jnp.float32).reshape(-1)

    s_rows = None
    if eff_gs != -1:
        num_groups = numel // eff_gs
        if q_scale_f.size == num_groups:
            if k % eff_gs == 0:                     # groups nest inside a filter row
                s_rows = q_scale_f.reshape(c_out, k // eff_gs)
            elif eff_gs % k == 0:                   # each group spans whole rows
                rows_per_group = eff_gs // k
                s_rows = jnp.repeat(q_scale_f, rows_per_group).reshape(c_out, 1)
            else:
                # TODO(synk): groups straddle filter rows; non-compact fallback
                # (costs one extra weight-sized HBM read in the quant kernel).
                s_rows = jnp.repeat(q_scale_f, eff_gs).reshape(c_out, k)
        elif q_scale_f.size == 1:
            s_rows = jnp.broadcast_to(q_scale_f.reshape(1, 1), (c_out, 1))
        else:
            eff_gs = -1
    if eff_gs == -1:
        # TODO(synk): torch broadcasts q_scale elementwise when numel > 1 here;
        # only the scalar fallback is implemented.
        s_rows = jnp.broadcast_to(q_scale_f[0].reshape(1, 1), (c_out, 1))

    g = s_rows.shape[1]
    gs_row = k // g
    inv_rows = 1.0 / (s_rows + 1e-9)     # compact reciprocal, computed once

    # --- lane-dense padded sizes (multiples of 128 on Cout and K) ---
    c_pad = _round_up(c_out, 128)
    k_pad = _round_up(k, 128)

    w0_rows = jnp.pad(w0_flat, ((0, c_pad - c_out), (0, 0)))
    lora_b_rows = jnp.pad(lora_b.astype(jnp.float32), ((0, c_pad - c_out), (0, 0)))
    s_rows_p = jnp.pad(s_rows, ((0, c_pad - c_out), (0, 0)), constant_values=1.0)
    inv_rows_p = jnp.pad(inv_rows, ((0, c_pad - c_out), (0, 0)), constant_values=1.0)

    # --- Pallas: LoRA matmul + fake-quant, emitted directly in MXU dtype ---
    w_q = quantize_weight_pallas(
        w0_rows, lora_a.astype(jnp.float32), lora_b_rows, s_rows_p, inv_rows_p,
        alpha=alpha, q_n=q_n, q_p=q_p, gs_row=gs_row, k_pad=k_pad,
        out_dtype=mxu_dtype)

    # --- im2col + Pallas conv-as-matmul ---
    patches, oh, ow = im2col_nhwc(x, kh, kw, stride, padding, dilation)
    m = patches.shape[0]
    tm_eff = min(tm, _round_up(m, 8))
    m_pad = _round_up(m, tm_eff)
    patches = jnp.pad(patches, ((0, m_pad - m), (0, k_pad - k))).astype(mxu_dtype)

    tn = 256 if c_pad % 256 == 0 else 128
    if k_pad % 512 == 0:
        tk = 512
    elif k_pad % 256 == 0:
        tk = 256
    else:
        tk = 128

    if bias is None:
        bias_row = jnp.zeros((c_out,), jnp.float32)
    else:
        bias_row = bias.astype(jnp.float32)
    bias_row = jnp.pad(bias_row, (0, c_pad - c_out)).reshape(1, c_pad)

    out_flat = conv_matmul_pallas(patches, w_q, bias_row, x.dtype, tm_eff, tn, tk)

    n = x.shape[0]
    out = out_flat[:m, :c_out].reshape(n, oh, ow, c_out).transpose(0, 3, 1, 2)
    return out   # NCHW


# ---------------------------------------------------------------------------
# Pure-JAX reference (same math as the torch forward, lax conv)
# ---------------------------------------------------------------------------
def l4q_conv2d_reference(x, w0, lora_a, lora_b, bias, q_scale, *, alpha, n_bits,
                         quant_group_size, stride, padding, dilation):
    c_out = w0.shape[0]
    q_n, q_p = get_quantization_bounds(n_bits)
    delta_w = (lora_b @ lora_a).reshape(w0.shape)
    w_comb = w0 + alpha * delta_w
    num_groups = w_comb.size // quant_group_size
    wg = w_comb.reshape(num_groups, quant_group_size)
    s = q_scale.reshape(num_groups, 1)
    w_q = (jnp.round(jnp.clip(wg / (s + 1e-9), q_n, q_p)) * s).reshape(w0.shape)
    out = jax.lax.conv_general_dilated(
        x, w_q, window_strides=stride,
        padding=[(padding[0], padding[0]), (padding[1], padding[1])],
        rhs_dilation=dilation,
        dimension_numbers=("NCHW", "OIHW", "NCHW"))
    return out + bias.reshape(1, c_out, 1, 1)


if __name__ == "__main__":
    # Small, deterministic config.
    N, C_in, H, W = 2, 4, 16, 16
    C_out, KH, KW = 8, 3, 3
    rank = 4
    n_bits = 4
    alpha = 1.0
    quant_group_size = C_in * KH * KW        # 36 -> 8 quant groups (per filter)
    stride, padding, dilation, groups = (1, 1), (1, 1), (1, 1), 1

    key = jax.random.PRNGKey(0)
    k1, k2, k3, k4, k5 = jax.random.split(key, 5)

    fan_in = C_in * KH * KW
    bound_w = 1.0 / math.sqrt(fan_in)        # kaiming_uniform_(a=sqrt(5)) bound
    w0 = jax.random.uniform(k1, (C_out, C_in, KH, KW), jnp.float32, -bound_w, bound_w)
    lora_a = jax.random.uniform(k2, (rank, fan_in), jnp.float32, -bound_w, bound_w)
    # reset_parameters() zero-inits lora_b; use a small nonzero init so the LoRA
    # matmul path is actually exercised (still fully deterministic).
    lora_b = 0.05 * jax.random.normal(k3, (C_out, rank), jnp.float32)
    bias = jax.random.uniform(k4, (C_out,), jnp.float32, -bound_w, bound_w)

    # q_scale init: per-group max-abs / q_p of w_comb (stand-in for l4q_init_scale).
    q_n, q_p = get_quantization_bounds(n_bits)
    w_comb_init = w0 + alpha * (lora_b @ lora_a).reshape(w0.shape)
    num_groups = w0.size // quant_group_size
    q_scale = (jnp.max(jnp.abs(w_comb_init.reshape(num_groups, quant_group_size)),
                       axis=1) / q_p).astype(jnp.float32)

    x = jax.random.normal(k5, (N, C_in, H, W), jnp.float32)

    common = dict(alpha=alpha, n_bits=n_bits, quant_group_size=quant_group_size,
                  stride=stride, padding=padding, dilation=dilation, groups=groups)

    fwd_f32 = jax.jit(functools.partial(l4q_conv2d_forward,
                                        mxu_dtype=jnp.float32, **common))
    fwd_bf16 = jax.jit(functools.partial(l4q_conv2d_forward,
                                         mxu_dtype=jnp.bfloat16, **common))

    out_f32 = jax.block_until_ready(fwd_f32(x, w0, lora_a, lora_b, bias, q_scale))
    out_bf16 = jax.block_until_ready(fwd_bf16(x, w0, lora_a, lora_b, bias, q_scale))

    ref = jax.block_until_ready(l4q_conv2d_reference(
        x, w0, lora_a, lora_b, bias, q_scale, alpha=alpha, n_bits=n_bits,
        quant_group_size=quant_group_size, stride=stride, padding=padding,
        dilation=dilation))

    assert out_f32.shape == (N, C_out, H, W), out_f32.shape
    assert jnp.allclose(out_f32, ref, atol=1e-4, rtol=1e-4), \
        float(jnp.max(jnp.abs(out_f32 - ref)))
    # bf16 MXU fast path: looser tolerance (bf16 mantissa on activations).
    assert jnp.allclose(out_bf16.astype(jnp.float32), ref, atol=5e-2, rtol=5e-2), \
        float(jnp.max(jnp.abs(out_bf16.astype(jnp.float32) - ref)))
    print("KERNEL_OK")
</pallas_src>

<mosaic_0001>
module attributes {stable_mosaic.version = 11 : i64} {
  func.func @_conv_matmul_kernel(%arg0: i32, %arg1: i32, %arg2: i32, %arg3: memref<256x128xf32, #tpu.memory_space<vmem>>, %arg4: memref<128x128xf32, #tpu.memory_space<vmem>>, %arg5: memref<1x128xf32, #tpu.memory_space<vmem>>, %arg6: memref<256x128xf32, #tpu.memory_space<vmem>>, %arg7: memref<256x128xf32, #tpu.memory_space<vmem>>) attributes {dimension_semantics = [#tpu.dimension_semantics<parallel>, #tpu.dimension_semantics<parallel>, #tpu.dimension_semantics<arbitrary>], iteration_bounds = array<i64: 2, 1, 1>, scalar_prefetch = 0 : i64, scratch_operands = 1 : i64, tpu.core_type = #tpu.core_type<tc>, window_params = [{transform_indices = @transform_0, window_bounds = array<i64: 256, 128>}, {transform_indices = @transform_1, window_bounds = array<i64: 128, 128>}, {transform_indices = @transform_2, window_bounds = array<i64: 1, 128>}, {transform_indices = @transform_3, window_bounds = array<i64: 256, 128>}]} {
    %c0_i32 = arith.constant 0 : i32
    %0 = arith.cmpi eq, %arg2, %c0_i32 : i32
    %1 = arith.extui %0 : i1 to i32
    %c0_i32_0 = arith.constant 0 : i32
    %2 = arith.cmpi ne, %1, %c0_i32_0 : i32
    scf.if %2 {
      %cst_10 = arith.constant 0.000000e+00 : f32
      %12 = vector.broadcast %cst_10 : f32 to vector<256x128xf32>
      %c0_11 = arith.constant 0 : index
      %c0_12 = arith.constant 0 : index
      %13 = vector.load %arg7[%c0_11, %c0_12] : memref<256x128xf32, #tpu.memory_space<vmem>>, vector<256x128xf32>
      tpu.vector_store %arg7[%c0_11, %c0_12], %12 {strides = array<i32>} : memref<256x128xf32, #tpu.memory_space<vmem>>, vector<256x128xf32>,
    } else {
    }
    %c0 = arith.constant 0 : index
    %c0_1 = arith.constant 0 : index
    %3 = vector.load %arg7[%c0, %c0_1] : memref<256x128xf32, #tpu.memory_space<vmem>>, vector<256x128xf32>
    %c0_2 = arith.constant 0 : index
    %c0_3 = arith.constant 0 : index
    %4 = vector.load %arg3[%c0_2, %c0_3] : memref<256x128xf32, #tpu.memory_space<vmem>>, vector<256x128xf32>
    %c0_4 = arith.constant 0 : index
    %c0_5 = arith.constant 0 : index
    %5 = vector.load %arg4[%c0_4, %c0_5] : memref<128x128xf32, #tpu.memory_space<vmem>>, vector<128x128xf32>
    %cst = arith.constant dense<0.000000e+00> : vector<256x128xf32>
    %6 = tpu.matmul %4, %5, %cst {dimension_numbers = #tpu.dot_dimension_numbers<[1], [1], [0], [0], [0, 0, 1, 0], [], []>} : vector<256x128xf32>, vector<128x128xf32>, vector<256x128xf32> -> vector<256x128xf32>
    %7 = arith.addf %3, %6 : vector<256x128xf32>
    %c0_6 = arith.constant 0 : index
    %c0_7 = arith.constant 0 : index
    %8 = vector.load %arg7[%c0_6, %c0_7] : memref<256x128xf32, #tpu.memory_space<vmem>>, vector<256x128xf32>
    tpu.vector_store %arg7[%c0_6, %c0_7], %7 {strides = array<i32>} : memref<256x128xf32, #tpu.memory_space<vmem>>, vector<256x128xf32>,
    %c0_i32_8 = arith.constant 0 : i32
    %9 = arith.cmpi eq, %arg2, %c0_i32_8 : i32
    %10 = arith.extui %9 : i1 to i32
    %c0_i32_9 = arith.constant 0 : i32
    %11 = arith.cmpi ne, %10, %c0_i32_9 : i32
    scf.if %11 {
      %c0_10 = arith.constant 0 : index
      %c0_11 = arith.constant 0 : index
      %12 = vector.load %arg7[%c0_10, %c0_11] : memref<256x128xf32, #tpu.memory_space<vmem>>, vector<256x128xf32>
      %c0_12 = arith.constant 0 : index
      %c0_13 = arith.constant 0 : index
      %13 = vector.load %arg5[%c0_12, %c0_13] : memref<1x128xf32, #tpu.memory_space<vmem>>, vector<1x128xf32>
      %14 = vector.broadcast %13 : vector<1x128xf32> to vector<256x128xf32>
      %15 = arith.addf %12, %14 : vector<256x128xf32>
      %c0_14 = arith.constant 0 : index
      %c0_15 = arith.constant 0 : index
      %16 = vector.load %arg6[%c0_14, %c0_15] : memref<256x128xf32, #tpu.memory_space<vmem>>, vector<256x128xf32>
      tpu.vector_store %arg6[%c0_14, %c0_15], %15 {strides = array<i32>} : memref<256x128xf32, #tpu.memory_space<vmem>>, vector<256x128xf32>,
    } else {
    }
    return
  }
  func.func @transform_0(%arg0: i32, %arg1: i32, %arg2: i32) -> (i32, i32) {
    %c0_i32 = arith.constant 0 : i32
    return %arg0, %arg2 : i32, i32
  }
  func.func @transform_1(%arg0: i32, %arg1: i32, %arg2: i32) -> (i32, i32) {
    %c0_i32 = arith.constant 0 : i32
    return %arg1, %arg2 : i32, i32
  }
  func.func @transform_2(%arg0: i32, %arg1: i32, %arg2: i32) -> (i32, i32) {
    %c0_i32 = arith.constant 0 : i32
    %c0_i32_0 = arith.constant 0 : i32
    return %c0_i32, %arg1 : i32, i32
  }
  func.func @transform_3(%arg0: i32, %arg1: i32, %arg2: i32) -> (i32, i32) {
    %c0_i32 = arith.constant 0 : i32
    return %arg0, %arg1 : i32, i32
  }
}

module attributes {stable_mosaic.version = 11 : i64} {
  func.func @_quant_weight_kernel(%arg0: i32, %arg1: memref<128x36xf32, #tpu.memory_space<vmem>>, %arg2: memref<4x36xf32, #tpu.memory_space<vmem>>, %arg3: memref<128x4xf32, #tpu.memory_space<vmem>>, %arg4: memref<128x1xf32, #tpu.memory_space<vmem>>, %arg5: memref<128x1xf32, #tpu.memory_space<vmem>>, %arg6: memref<128x128xf32, #tpu.memory_space<vmem>>) attributes {dimension_semantics = [#tpu.dimension_semantics<parallel>], iteration_bounds = array<i64: 1>, scalar_prefetch = 0 : i64, scratch_operands = 0 : i64, tpu.core_type = #tpu.core_type<tc>, window_params = [{transform_indices = @transform_0, window_bounds = array<i64: 128, 36>}, {pipeline_mode = #tpu.pipeline_mode<synchronous>, transform_indices = @transform_1, window_bounds = array<i64: 4, 36>}, {transform_indices = @transform_2, window_bounds = array<i64: 128, 4>}, {transform_indices = @transform_3, window_bounds = array<i64: 128, 1>}, {transform_indices = @transform_4, window_bounds = array<i64: 128, 1>}, {transform_indices = @transform_5, window_bounds = array<i64: 128, 128>}]} {
    %c0 = arith.constant 0 : index
    %c0_0 = arith.constant 0 : index
    %0 = vector.load %arg3[%c0, %c0_0] : memref<128x4xf32, #tpu.memory_space<vmem>>, vector<128x4xf32>
    %c0_1 = arith.constant 0 : index
    %c0_2 = arith.constant 0 : index
    %1 = vector.load %arg2[%c0_1, %c0_2] : memref<4x36xf32, #tpu.memory_space<vmem>>, vector<4x36xf32>
    %cst = arith.constant dense<0.000000e+00> : vector<128x36xf32>
    %2 = tpu.matmul %0, %1, %cst {dimension_numbers = #tpu.dot_dimension_numbers<[1], [0], [0], [1], [0, 0, 1, 1], [], []>} : vector<128x4xf32>, vector<4x36xf32>, vector<128x36xf32> -> vector<128x36xf32>
    %c0_3 = arith.constant 0 : index
    %c0_4 = arith.constant 0 : index
    %3 = vector.load %arg1[%c0_3, %c0_4] : memref<128x36xf32, #tpu.memory_space<vmem>>, vector<128x36xf32>
    %cst_5 = arith.constant 1.000000e+00 : f32
    %4 = vector.broadcast %cst_5 : f32 to vector<128x36xf32>
    %5 = arith.mulf %4, %2 : vector<128x36xf32>
    %6 = arith.addf %3, %5 : vector<128x36xf32>
    %c0_6 = arith.constant 0 : index
    %c0_7 = arith.constant 0 : index
    %7 = vector.load %arg5[%c0_6, %c0_7] : memref<128x1xf32, #tpu.memory_space<vmem>>, vector<128x1xf32>
    %8 = vector.broadcast %7 : vector<128x1xf32> to vector<128x36xf32>
    %9 = arith.mulf %6, %8 : vector<128x36xf32>
    %cst_8 = arith.constant -8.000000e+00 : f32
    %cst_9 = arith.constant 7.000000e+00 : f32
    %10 = vector.broadcast %cst_8 : f32 to vector<128x36xf32>
    %11 = arith.maximumf %10, %9 : vector<128x36xf32>
    %12 = vector.broadcast %cst_9 : f32 to vector<128x36xf32>
    %13 = arith.minimumf %12, %11 : vector<128x36xf32>
    %14 = math.roundeven %13 : vector<128x36xf32>
    %c0_10 = arith.constant 0 : index
    %c0_11 = arith.constant 0 : index
    %15 = vector.load %arg4[%c0_10, %c0_11] : memref<128x1xf32, #tpu.memory_space<vmem>>, vector<128x1xf32>
    %16 = vector.broadcast %15 : vector<128x1xf32> to vector<128x36xf32>
    %17 = arith.mulf %14, %16 : vector<128x36xf32>
    %cst_12 = arith.constant 0.000000e+00 : f32
    %18 = vector.broadcast %cst_12 : f32 to vector<128x128xf32>
    %c0_13 = arith.constant 0 : index
    %c0_14 = arith.constant 0 : index
    %19 = vector.load %arg6[%c0_13, %c0_14] : memref<128x128xf32, #tpu.memory_space<vmem>>, vector<128x128xf32>
    tpu.vector_store %arg6[%c0_13, %c0_14], %18 {strides = array<i32>} : memref<128x128xf32, #tpu.memory_space<vmem>>, vector<128x128xf32>,
    %c0_15 = arith.constant 0 : index
    %c0_16 = arith.constant 0 : index
    %20 = vector.load %arg6[%c0_15, %c0_16] : memref<128x128xf32, #tpu.memory_space<vmem>>, vector<128x36xf32>
    tpu.vector_store %arg6[%c0_15, %c0_16], %17 {strides = array<i32>} : memref<128x128xf32, #tpu.memory_space<vmem>>, vector<128x36xf32>,
    return
  }
  func.func @transform_0(%arg0: i32) -> (i32, i32) {
    %c0_i32 = arith.constant 0 : i32
    %c0_i32_0 = arith.constant 0 : i32
    return %arg0, %c0_i32 : i32, i32
  }
  func.func @transform_1(%arg0: i32) -> (i32, i32) {
    %c0_i32 = arith.constant 0 : i32
    %c0_i32_0 = arith.constant 0 : i32
    %c0_i32_1 = arith.constant 0 : i32
    return %c0_i32, %c0_i32_0 : i32, i32
  }
  func.func @transform_2(%arg0: i32) -> (i32, i32) {
    %c0_i32 = arith.constant 0 : i32
    %c0_i32_0 = arith.constant 0 : i32
    return %arg0, %c0_i32 : i32, i32
  }
  func.func @transform_3(%arg0: i32) -> (i32, i32) {
    %c0_i32 = arith.constant 0 : i32
    %c0_i32_0 = arith.constant 0 : i32
    return %arg0, %c0_i32 : i32, i32
  }
  func.func @transform_4(%arg0: i32) -> (i32, i32) {
    %c0_i32 = arith.constant 0 : i32
    %c0_i32_0 = arith.constant 0 : i32
    return %arg0, %c0_i32 : i32, i32
  }
  func.func @transform_5(%arg0: i32) -> (i32, i32) {
    %c0_i32 = arith.constant 0 : i32
    %c0_i32_0 = arith.constant 0 : i32
    return %arg0, %c0_i32 : i32, i32
  }
}

</mosaic_0001>

<bundles_post_ra>
// kernel: l4q_conv2d_forward.2
= control target key start
LH: loop header
LB: loop body
LE: loop exit
PB: predicated region body
PF: predicated region fallthrough
CT: control target
= control target key end

     0   :  { %vm86_vm0 = vcmask 1043456   ;;  %v658_v0 = vmov 0   ;;  %vm37_vm1 = vcmask 31744   ;;  %v659_v50 = vmov 0.0   ;;  %s1068_s4 = inlined_call_operand.vmem [shape: f32[128,1], index: 4, kind: input, shape index: {}]   ;;  %s1069_s1 = inlined_call_operand.vmem [shape: f32[4,36], index: 1, kind: input, shape index: {}]   ;;  %s1070_s2 = inlined_call_operand.vmem [shape: f32[128,4], index: 2, kind: input, shape index: {}]   ;;  %s1071_s3 = inlined_call_operand.vmem [shape: f32[128,1], index: 3, kind: input, shape index: {}]   ;;  %s1072_s5 = inlined_call_operand.vmem [shape: f32[128,128], index: 5, kind: output, shape index: {}]   ;;  %s1073_s0 = inlined_call_operand.vmem [shape: f32[128,36], index: 0, kind: input, shape index: {}]  }
   0x1   :  { %657 = vset.pattern.permute.xlu1 %v658_v0  ;;  %656 = vset.pattern.permute.xlu0 %v658_v0  ;;  %v269_v1 = vld [vmem:[%s1068_s4 + $0x10] sm:$0xff]  ;;  %v267_v2 = vld [vmem:[%s1068_s4] sm:$0xff]  ;;  %v21_v6 = vld [vmem:[%s1070_s2 + $0x8] sm:$0xff]  ;;  %540 = vst [vmem:[%s1072_s5 + $0x8] sm:$0xff] %v659_v50  ;;  %vm555_vm2 = vcmask 293888  }
   0x2   :  { %v36_v3 = vld [vmem:[%s1069_s1] sm:$0xf]  ;;  %295 = vperm.xlu1 %657, %v269_v1   ;;  %285 = vperm.xlu0 %656, %v267_v2   ;;  %v29_v7 = vld [vmem:[%s1070_s2 + $0x48] sm:$0xff]  ;;  %v270_v8 = vld [vmem:[%s1068_s4 + $0x18] sm:$0xff]  ;;  %539 = vst [vmem:[%s1072_s5] sm:$0xff] %v659_v50 }
   0x3   :  { %v20_v4 = vld [vmem:[%s1070_s2] sm:$0xff]  ;;  %610 = vmatprep.subr.msk.mxu0 %vm86_vm0, %v36_v3  ;;  %636 = vmatprep.subr.msk.mxu1 %vm86_vm0, %v36_v3  ;;  %v268_v9 = vld [vmem:[%s1068_s4 + $0x8] sm:$0xff]  ;;  %v22_v10 = vld [vmem:[%s1070_s2 + $0x10] sm:$0xff]  ;;  %541 = vst [vmem:[%s1072_s5 + $0x10] sm:$0xff] %v659_v50 }
   0x4   :  { %v28_v5 = vld [vmem:[%s1070_s2 + $0x40] sm:$0xff]  ;;  %611 = vmatpush3.msk.msra.mxu0 %vm86_vm0, %v36_v3  ;;  %637 = vmatpush3.msk.msra.mxu1 %vm86_vm0, %v36_v3  ;;  %v30_v11 = vld [vmem:[%s1070_s2 + $0x50] sm:$0xff]  ;;  %v23_v12 = vld [vmem:[%s1070_s2 + $0x18] sm:$0xff]  ;;  %542 = vst [vmem:[%s1072_s5 + $0x18] sm:$0xff] %v659_v50 }
   0x5   :  { %612 = vmatprep.mubr.msk.f32.mxu0 %vm37_vm1, %v20_v4  ;;  %624 = vmatprep.mubr.msk.f32.mxu1 %vm37_vm1, %v28_v5  ;;  %v31_v13 = vld [vmem:[%s1070_s2 + $0x58] sm:$0xff]  ;;  %v272_v14 = vld [vmem:[%s1068_s4 + $0x28] sm:$0xff]  ;;  %v271_v15 = vld [vmem:[%s1068_s4 + $0x20] sm:$0xff]  ;;  %543 = vst [vmem:[%s1072_s5 + $0x20] sm:$0xff] %v659_v50 }
   0x6   :  { %613 = vmatmul.mubr.msk.f32.vlgmr.msra.gmra.mrb[0].mxu0 %vm37_vm1, %v21_v6  ;;  %625 = vmatmul.mubr.msk.f32.vlgmr.msra.gmra.mrb[0].mxu1 %vm37_vm1, %v29_v7  ;;  %v24_v16 = vld [vmem:[%s1070_s2 + $0x20] sm:$0xff]  ;;  %v25_v18 = vld [vmem:[%s1070_s2 + $0x28] sm:$0xff]  ;;  %v274_v20 = vld [vmem:[%s1068_s4 + $0x38] sm:$0xff]  ;;  %544 = vst [vmem:[%s1072_s5 + $0x28] sm:$0xff] %v659_v50 }
   0x7   :  { %300 = vperm.xlu1 %657, %v270_v8   ;;  %290 = vperm.xlu0 %656, %v268_v9   ;;  %v32_v17 = vld [vmem:[%s1070_s2 + $0x60] sm:$0xff]  ;;  %v33_v19 = vld [vmem:[%s1070_s2 + $0x68] sm:$0xff]  ;;  %v273_v21 = vld [vmem:[%s1068_s4 + $0x30] sm:$0xff]  ;;  %545 = vst [vmem:[%s1072_s5 + $0x30] sm:$0xff] %v659_v50 }
   0x8   :  { %615 = vmatprep.mubr.msk.f32.mxu0 %vm37_vm1, %v22_v10  ;;  %627 = vmatprep.mubr.msk.f32.mxu1 %vm37_vm1, %v30_v11  ;;  %v26_v22 = vld [vmem:[%s1070_s2 + $0x30] sm:$0xff]  ;;  %v27_v24 = vld [vmem:[%s1070_s2 + $0x38] sm:$0xff]  ;;  %v276_v26 = vld [vmem:[%s1068_s4 + $0x48] sm:$0xff]  ;;  %546 = vst [vmem:[%s1072_s5 + $0x38] sm:$0xff] %v659_v50 }
   0x9   :  { %v34_v23 = vld [vmem:[%s1070_s2 + $0x70] sm:$0xff]  ;;  %v35_v25 = vld [vmem:[%s1070_s2 + $0x78] sm:$0xff]  ;;  %v275_v27 = vld [vmem:[%s1068_s4 + $0x40] sm:$0xff]  ;;  %547 = vst [vmem:[%s1072_s5 + $0x40] sm:$0xff] %v659_v50 }
   0xa   :  { %616 = vmatmul.mubr.msk.f32.gmra.mrb[2].mxu0 %vm37_vm1, %v23_v12  ;;  %628 = vmatmul.mubr.msk.f32.gmra.mrb[2].mxu1 %vm37_vm1, %v31_v13  ;;  %v278_v28 = vld [vmem:[%s1068_s4 + $0x58] sm:$0xff]  ;;  %v277_v29 = vld [vmem:[%s1068_s4 + $0x50] sm:$0xff]  ;;  %v280_v30 = vld [vmem:[%s1068_s4 + $0x68] sm:$0xff]  ;;  %548 = vst [vmem:[%s1072_s5 + $0x48] sm:$0xff] %v659_v50 }
   0xb   :  { %310 = vperm.xlu1 %657, %v272_v14   ;;  %305 = vperm.xlu0 %656, %v271_v15   ;;  %v279_v31 = vld [vmem:[%s1068_s4 + $0x60] sm:$0xff]  ;;  %v282_v32 = vld [vmem:[%s1068_s4 + $0x78] sm:$0xff]  ;;  %v281_v33 = vld [vmem:[%s1068_s4 + $0x70] sm:$0xff]  ;;  %549 = vst [vmem:[%s1072_s5 + $0x50] sm:$0xff] %v659_v50 }
   0xc   :  { %618 = vmatprep.mubr.msk.f32.mxu0 %vm37_vm1, %v24_v16  ;;  %630 = vmatprep.mubr.msk.f32.mxu1 %vm37_vm1, %v32_v17  ;;  %v428_v34 = vld [vmem:[%s1071_s3 + $0x8] sm:$0xff]  ;;  %v427_v35 = vld [vmem:[%s1071_s3] sm:$0xff]  ;;  %v430_v36 = vld [vmem:[%s1071_s3 + $0x18] sm:$0xff]  ;;  %550 = vst [vmem:[%s1072_s5 + $0x58] sm:$0xff] %v659_v50 }
   0xd   :  { %v429_v37 = vld [vmem:[%s1071_s3 + $0x10] sm:$0xff]  ;;  %v432_v38 = vld [vmem:[%s1071_s3 + $0x28] sm:$0xff]  ;;  %v431_v39 = vld [vmem:[%s1071_s3 + $0x20] sm:$0xff]  ;;  %551 = vst [vmem:[%s1072_s5 + $0x60] sm:$0xff] %v659_v50 }
   0xe   :  { %619 = vmatmul.mubr.msk.f32.gmra.mrb[4].mxu0 %vm37_vm1, %v25_v18  ;;  %631 = vmatmul.mubr.msk.f32.gmra.mrb[4].mxu1 %vm37_vm1, %v33_v19  ;;  %v434_v40 = vld [vmem:[%s1071_s3 + $0x38] sm:$0xff]  ;;  %v433_v41 = vld [vmem:[%s1071_s3 + $0x30] sm:$0xff]  ;;  %v436_v42 = vld [vmem:[%s1071_s3 + $0x48] sm:$0xff]  ;;  %552 = vst [vmem:[%s1072_s5 + $0x68] sm:$0xff] %v659_v50 }
   0xf   :  { %320 = vperm.xlu1 %657, %v274_v20   ;;  %315 = vperm.xlu0 %656, %v273_v21   ;;  %v435_v43 = vld [vmem:[%s1071_s3 + $0x40] sm:$0xff]  ;;  %v438_v44 = vld [vmem:[%s1071_s3 + $0x58] sm:$0xff]  ;;  %v437_v45 = vld [vmem:[%s1071_s3 + $0x50] sm:$0xff]  ;;  %553 = vst [vmem:[%s1072_s5 + $0x70] sm:$0xff] %v659_v50 }
  0x10   :  { %621 = vmatprep.mubr.msk.f32.mxu0 %vm37_vm1, %v26_v22  ;;  %633 = vmatprep.mubr.msk.f32.mxu1 %vm37_vm1, %v34_v23  ;;  %v440_v46 = vld [vmem:[%s1071_s3 + $0x68] sm:$0xff]  ;;  %v439_v47 = vld [vmem:[%s1071_s3 + $0x60] sm:$0xff]  ;;  %v442_v48 = vld [vmem:[%s1071_s3 + $0x78] sm:$0xff]  ;;  %554 = vst [vmem:[%s1072_s5 + $0x78] sm:$0xff] %v659_v50 }
  0x11   :  { %v441_v49 = vld [vmem:[%s1071_s3 + $0x70] sm:$0xff]  ;;  %v236_v9 = vld [vmem:[%s1073_s0 + $0x8] sm:$0xff]  ;;  %v235_v13 = vld [vmem:[%s1073_s0] sm:$0xff] }
  0x12   :  { %622 = vmatmul.mubr.msk.f32.gmra.mrb[6].mxu0 %vm37_vm1, %v27_v24  ;;  %634 = vmatmul.mubr.msk.f32.gmra.mrb[6].mxu1 %vm37_vm1, %v35_v25  ;;  %v244_v10 = vld [vmem:[%s1073_s0 + $0x48] sm:$0xff]  ;;  %v243_v14 = vld [vmem:[%s1073_s0 + $0x40] sm:$0xff]  ;;  %v238_v23 = vld [vmem:[%s1073_s0 + $0x18] sm:$0xff] }
  0x13   :  { %330 = vperm.xlu1 %657, %v276_v26   ;;  %325 = vperm.xlu0 %656, %v275_v27   ;;  %v246_v24 = vld [vmem:[%s1073_s0 + $0x58] sm:$0xff]  ;;  %v237_v27 = vld [vmem:[%s1073_s0 + $0x10] sm:$0xff] }
  0x17   :  { %340 = vperm.xlu1 %657, %v278_v28   ;;  %335 = vperm.xlu0 %656, %v277_v29   ;;  %v245_v28 = vld [vmem:[%s1073_s0 + $0x50] sm:$0xff] }
  0x1b   :  { %350 = vperm.xlu1 %657, %v280_v30   ;;  %345 = vperm.xlu0 %656, %v279_v31  }
  0x1f   :  { %360 = vperm.xlu1 %657, %v282_v32   ;;  %355 = vperm.xlu0 %656, %v281_v33  }
  0x23   :  { %450 = vperm.xlu1 %657, %v428_v34   ;;  %445 = vperm.xlu0 %656, %v427_v35  }
  0x27   :  { %460 = vperm.xlu1 %657, %v430_v36   ;;  %455 = vperm.xlu0 %656, %v429_v37  }
  0x2b   :  { %470 = vperm.xlu1 %657, %v432_v38   ;;  %465 = vperm.xlu0 %656, %v431_v39  }
  0x2f   :  { %480 = vperm.xlu1 %657, %v434_v40   ;;  %475 = vperm.xlu0 %656, %v433_v41  }
  0x33   :  { %490 = vperm.xlu1 %657, %v436_v42   ;;  %485 = vperm.xlu0 %656, %v435_v43  }
  0x37   :  { %500 = vperm.xlu1 %657, %v438_v44   ;;  %495 = vperm.xlu0 %656, %v437_v45  }
  0x3b   :  { %510 = vperm.xlu1 %657, %v440_v46   ;;  %505 = vperm.xlu0 %656, %v439_v47  }
  0x3f   :  { %520 = vperm.xlu1 %657, %v442_v48   ;;  %515 = vperm.xlu0 %656, %v441_v49  }
  0x81   :  { %v905_v51 = vpop.permute.xlu1 %295  ;;  %v286_v52 = vpop.permute.xlu0 %285 }
  0x86   :  { %v301_v53 = vpop.permute.xlu1 %300  ;;  %v291_v54 = vpop.permute.xlu0 %290 }
  0x8a   :  { %v907_v55 = vpop.permute.xlu1 %310  ;;  %v909_v56 = vpop.permute.xlu0 %305 }
  0x8e   :  { %v911_v57 = vpop.permute.xlu1 %320  ;;  %v913_v58 = vpop.permute.xlu0 %315 }
  0x92   :  { %v331_v59 = vpop.permute.xlu1 %330  ;;  %v326_v60 = vpop.permute.xlu0 %325 }
  0x96   :  { %v341_v61 = vpop.permute.xlu1 %340  ;;  %v336_v62 = vpop.permute.xlu0 %335 }
  0x9a   :  { %v915_v63 = vpop.permute.xlu1 %350  ;;  %v917_v0 = vpop.permute.xlu0 %345 }
  0x9e   :  { %v919_v1 = vpop.permute.xlu1 %360  ;;  %v921_v2 = vpop.permute.xlu0 %355 }
  0xa2   :  { %v923_v3 = vpop.permute.xlu1 %450  ;;  %v925_v4 = vpop.permute.xlu0 %445 }
  0xa6   :  { %v927_v5 = vpop.permute.xlu1 %460  ;;  %v929_v6 = vpop.permute.xlu0 %455 }
  0xaa   :  { %v931_v7 = vpop.permute.xlu1 %470  ;;  %v933_v8 = vpop.permute.xlu0 %465 }
  0xae   :  { %v941_v11 = vpop.permute.xlu1 %480  ;;  %v943_v12 = vpop.permute.xlu0 %475 }
  0xb2   :  { %v491_v43 = vpop.permute.xlu1 %490  ;;  %v486_v44 = vpop.permute.xlu0 %485 }
  0xd9   :  { %v614_v15 = vpop.f32.mrb[0].mxu0  ;;  %v626_v16 = vpop.f32.mrb[0].mxu1 }
  0xda   :  { %v252_v17 = vadd.f32 %v614_v15, %v236_v9  ;;  %v260_v18 = vadd.f32 %v626_v16, %v244_v10  ;;  %v156_v19 = vpop.f32.mrb[1].mxu0  ;;  %v196_v20 = vpop.f32.mrb[1].mxu1 }
  0xdb   :  { %v251_v21 = vadd.f32 %v235_v13, %v156_v19  ;;  %v259_v22 = vadd.f32 %v243_v14, %v196_v20 }
  0xdc   :  { %v364_v25 = vmul.f32 %v291_v54, %v252_v17  ;;  %v372_v26 = vmul.f32 %v331_v59, %v260_v18 }
  0xdd   :  { %v363_v29 = vmul.f32 %v286_v52, %v251_v21  ;;  %v371_v30 = vmul.f32 %v326_v60, %v259_v22  ;;  %v617_v31 = vpop.f32.mrb[2].mxu0  ;;  %v629_v32 = vpop.f32.mrb[2].mxu1 }
  0xde   :  { %v380_v33 = vmax.f32 %v364_v25, -8.0  ;;  %v388_v34 = vmax.f32 %v372_v26, -8.0  ;;  %v254_v35 = vadd.f32 %v617_v31, %v238_v23  ;;  %v262_v36 = vadd.f32 %v629_v32, %v246_v24  ;;  %v166_v37 = vpop.f32.mrb[3].mxu0  ;;  %v206_v38 = vpop.f32.mrb[3].mxu1  ;;  %v239_v23 = vld [vmem:[%s1073_s0 + $0x20] sm:$0xff] }
  0xdf   :  { %v379_v39 = vmax.f32 %v363_v29, -8.0  ;;  %v387_v40 = vmax.f32 %v371_v30, -8.0  ;;  %v253_v41 = vadd.f32 %v237_v27, %v166_v37  ;;  %v261_v42 = vadd.f32 %v245_v28, %v206_v38  ;;  %v247_v24 = vld [vmem:[%s1073_s0 + $0x60] sm:$0xff] }
  0xe0   :  { %v396_v45 = vmin.f32 %v380_v33, 7.0  ;;  %v404_v46 = vmin.f32 %v388_v34, 7.0  ;;  %v366_v47 = vmul.f32 %v301_v53, %v254_v35  ;;  %v374_v48 = vmul.f32 %v341_v61, %v262_v36  ;;  %v240_v53 = vld [vmem:[%s1073_s0 + $0x28] sm:$0xff]  ;;  %v501_v35 = vpop.permute.xlu1 %500 }
  0xe1   :  { %v395_v49 = vmin.f32 %v379_v39, 7.0  ;;  %v403_v50 = vmin.f32 %v387_v40, 7.0  ;;  %v365_v52 = vmul.f32 %v905_v51, %v253_v41  ;;  %v373_v54 = vmul.f32 %v336_v62, %v261_v42  ;;  %v620_v59 = vpop.f32.mrb[4].mxu0  ;;  %v632_v60 = vpop.f32.mrb[4].mxu1  ;;  %v248_v51 = vld [vmem:[%s1073_s0 + $0x68] sm:$0xff]  ;;  %v242_v40 = vld [vmem:[%s1073_s0 + $0x38] sm:$0xff] }
  0xe2   :  { %v639_v9 = vround.rtne.f32 %v396_v45  ;;  %v647_v10 = vround.rtne.f32 %v404_v46  ;;  %v382_v13 = vmax.f32 %v366_v47, -8.0  ;;  %v390_v14 = vmax.f32 %v374_v48, -8.0  ;;  %v176_v15 = vpop.f32.mrb[5].mxu0  ;;  %v216_v16 = vpop.f32.mrb[5].mxu1  ;;  %v250_v41 = vld [vmem:[%s1073_s0 + $0x78] sm:$0xff]  ;;  %v241_v47 = vld [vmem:[%s1073_s0 + $0x30] sm:$0xff] }
  0xe3   :  { %v638_v17 = vround.rtne.f32 %v395_v49  ;;  %v646_v18 = vround.rtne.f32 %v403_v50  ;;  %v381_v19 = vmax.f32 %v365_v52, -8.0  ;;  %v389_v20 = vmax.f32 %v373_v54, -8.0  ;;  %v496_v42 = vpop.permute.xlu0 %495  ;;  %v249_v48 = vld [vmem:[%s1073_s0 + $0x70] sm:$0xff] }
  0xe4   :  { %v524_v61 = vmul.f32 %v639_v9, %v923_v3  ;;  %v532_v62 = vmul.f32 %v647_v10, %v491_v43  ;;  %v398_v21 = vmin.f32 %v382_v13, 7.0  ;;  %v406_v22 = vmin.f32 %v390_v14, 7.0 }
  0xe5   :  { %v523_v25 = vmul.f32 %v638_v17, %v925_v4  ;;  %v531_v26 = vmul.f32 %v646_v18, %v486_v44  ;;  %v397_v27 = vmin.f32 %v381_v19, 7.0  ;;  %v405_v28 = vmin.f32 %v389_v20, 7.0  ;;  %v623_v29 = vpop.f32.mrb[6].mxu0  ;;  %v635_v30 = vpop.f32.mrb[6].mxu1 }
  0xe6   :  { %557 = vst.msk [vmem:[%s1072_s5 + $0x8] sm:$0xff] %vm555_vm2, %v524_v61  ;;  %565 = vst.msk [vmem:[%s1072_s5 + $0x48] sm:$0xff] %vm555_vm2, %v532_v62  ;;  %v641_v3 = vround.rtne.f32 %v398_v21  ;;  %v649_v31 = vround.rtne.f32 %v406_v22  ;;  %v256_v32 = vadd.f32 %v620_v59, %v240_v53  ;;  %v264_v33 = vadd.f32 %v632_v60, %v248_v51  ;;  %v186_v4 = vpop.f32.mrb[7].mxu0  ;;  %v226_v34 = vpop.f32.mrb[7].mxu1 }
  0xe7   :  { %556 = vst.msk [vmem:[%s1072_s5] sm:$0xff] %vm555_vm2, %v523_v25  ;;  %564 = vst.msk [vmem:[%s1072_s5 + $0x40] sm:$0xff] %vm555_vm2, %v531_v26  ;;  %v640_v36 = vround.rtne.f32 %v397_v27  ;;  %v648_v37 = vround.rtne.f32 %v405_v28  ;;  %v255_v38 = vadd.f32 %v239_v23, %v176_v15  ;;  %v263_v39 = vadd.f32 %v247_v24, %v216_v16  ;;  %v511_v15 = vpop.permute.xlu1 %510  ;;  %v506_v20 = vpop.permute.xlu0 %505 }
  0xe8   :  { %v526_v43 = vmul.f32 %v641_v3, %v927_v5  ;;  %v534_v44 = vmul.f32 %v649_v31, %v501_v35  ;;  %v368_v45 = vmul.f32 %v907_v55, %v256_v32  ;;  %v376_v46 = vmul.f32 %v915_v63, %v264_v33 }
  0xe9   :  { %v525_v49 = vmul.f32 %v640_v36, %v929_v6  ;;  %v533_v50 = vmul.f32 %v648_v37, %v496_v42  ;;  %v367_v52 = vmul.f32 %v909_v56, %v255_v38  ;;  %v375_v5 = vmul.f32 %v917_v0, %v263_v39 }
  0xea   :  { %559 = vst.msk [vmem:[%s1072_s5 + $0x18] sm:$0xff] %vm555_vm2, %v526_v43  ;;  %567 = vst.msk [vmem:[%s1072_s5 + $0x58] sm:$0xff] %vm555_vm2, %v534_v44  ;;  %v384_v55 = vmax.f32 %v368_v45, -8.0  ;;  %v392_v63 = vmax.f32 %v376_v46, -8.0  ;;  %v258_v54 = vadd.f32 %v623_v29, %v242_v40  ;;  %v266_v59 = vadd.f32 %v635_v30, %v250_v41 }
  0xeb   :  { %558 = vst.msk [vmem:[%s1072_s5 + $0x10] sm:$0xff] %vm555_vm2, %v525_v49  ;;  %566 = vst.msk [vmem:[%s1072_s5 + $0x50] sm:$0xff] %vm555_vm2, %v533_v50  ;;  %v383_v56 = vmax.f32 %v367_v52, -8.0  ;;  %v391_v0 = vmax.f32 %v375_v5, -8.0  ;;  %v257_v6 = vadd.f32 %v241_v47, %v186_v4  ;;  %v265_v60 = vadd.f32 %v249_v48, %v226_v34  ;;  %v521_v30 = vpop.permute.xlu1 %520  ;;  %v516_v31 = vpop.permute.xlu0 %515 }
  0xec   :  { %v400_v9 = vmin.f32 %v384_v55, 7.0  ;;  %v408_v10 = vmin.f32 %v392_v63, 7.0  ;;  %v370_v13 = vmul.f32 %v911_v57, %v258_v54  ;;  %v378_v14 = vmul.f32 %v919_v1, %v266_v59 }
  0xed   :  { %v399_v16 = vmin.f32 %v383_v56, 7.0  ;;  %v407_v17 = vmin.f32 %v391_v0, 7.0  ;;  %v369_v18 = vmul.f32 %v913_v58, %v257_v6  ;;  %v377_v19 = vmul.f32 %v921_v2, %v265_v60 }
  0xee   :  { %v643_v53 = vround.rtne.f32 %v400_v9  ;;  %v651_v51 = vround.rtne.f32 %v408_v10  ;;  %v386_v61 = vmax.f32 %v370_v13, -8.0  ;;  %v394_v62 = vmax.f32 %v378_v14, -8.0 }
  0xef   :  { %v642_v21 = vround.rtne.f32 %v399_v16  ;;  %v650_v22 = vround.rtne.f32 %v407_v17  ;;  %v385_v23 = vmax.f32 %v369_v18, -8.0  ;;  %v393_v24 = vmax.f32 %v377_v19, -8.0 }
  0xf0   :  { %v528_v57 = vmul.f32 %v643_v53, %v931_v7  ;;  %v536_v25 = vmul.f32 %v651_v51, %v511_v15  ;;  %v402_v1 = vmin.f32 %v386_v61, 7.0  ;;  %v410_v26 = vmin.f32 %v394_v62, 7.0 }
  0xf1   :  { %v527_v27 = vmul.f32 %v642_v21, %v933_v8  ;;  %v535_v28 = vmul.f32 %v650_v22, %v506_v20  ;;  %v401_v58 = vmin.f32 %v385_v23, 7.0  ;;  %v409_v29 = vmin.f32 %v393_v24, 7.0 }
  0xf2   :  { %561 = vst.msk [vmem:[%s1072_s5 + $0x28] sm:$0xff] %vm555_vm2, %v528_v57  ;;  %569 = vst.msk [vmem:[%s1072_s5 + $0x68] sm:$0xff] %vm555_vm2, %v536_v25  ;;  %v645_v2 = vround.rtne.f32 %v402_v1  ;;  %v653_v7 = vround.rtne.f32 %v410_v26 }
  0xf3   :  { %560 = vst.msk [vmem:[%s1072_s5 + $0x20] sm:$0xff] %vm555_vm2, %v527_v27  ;;  %568 = vst.msk [vmem:[%s1072_s5 + $0x60] sm:$0xff] %vm555_vm2, %v535_v28  ;;  %v644_v8 = vround.rtne.f32 %v401_v58  ;;  %v652_v3 = vround.rtne.f32 %v409_v29 }
  0xf4   :  { %v530_v32 = vmul.f32 %v645_v2, %v941_v11  ;;  %v538_v33 = vmul.f32 %v653_v7, %v521_v30 }
  0xf5   :  { %v529_v4 = vmul.f32 %v644_v8, %v943_v12  ;;  %v537_v34 = vmul.f32 %v652_v3, %v516_v31 }
  0xf6   :  { %563 = vst.msk [vmem:[%s1072_s5 + $0x38] sm:$0xff] %vm555_vm2, %v530_v32  ;;  %571 = vst.msk [vmem:[%s1072_s5 + $0x78] sm:$0xff] %vm555_vm2, %v538_v33 }
  0xf7   :  { %562 = vst.msk [vmem:[%s1072_s5 + $0x30] sm:$0xff] %vm555_vm2, %v529_v4  ;;  %570 = vst.msk [vmem:[%s1072_s5 + $0x70] sm:$0xff] %vm555_vm2, %v537_v34 }

// kernel: l4q_conv2d_forward.3
= control target key start
LH: loop header
LB: loop body
LE: loop exit
PB: predicated region body
PF: predicated region fallthrough
CT: control target
= control target key end

     0   :  { %s1139_s12 = smov 0   ;;  %s1141_s13 = smov 0   ;;  %s1332_s0 = inlined_call_operand.vmem [shape: f32[512,128], index: 0, kind: input, shape index: {}]   ;;  %s1333_s1 = inlined_call_operand.vmem [shape: f32[128,128], index: 1, kind: input, shape index: {}]   ;;  %s1334_s2 = inlined_call_operand.vmem [shape: f32[1,128], index: 2, kind: input, shape index: {}]   ;;  %s1335_s3 = inlined_call_operand.vmem [shape: f32[512,128], index: 3, kind: output, shape index: {}]  }
   0x1   :  { %s1143_s14 = smov 0  }
   0x2 LB: > { %s32_s15 = sadd.s32 1, %s1113_s13  ;;  %p887_p0 = scmp.ge.s32.totalorder %s1117_s14, 1  ;;  %s1117_s14 = sphi %s1143_s14, %s13_s14   ;;  %s1113_s13 = sphi %s1141_s13, %s1337_s13   ;;  %s1109_s12 = sphi %s1139_s12, %s1336_s12  }
   0x3   : > { %p34_p1 = scmp.ge.s32.totalorder %s32_s15, 2  ;;  %p188_p2 = scmp.lt.s32.totalorder %s1117_s14, 3 }
   0x5   : > { %s1339_s15 = smov (%p34_p1, %s32_s15), 0  ;;  %p189_p3 = pnand %p887_p0, %p188_p2 }
   0x6   : > { %v359_v0 = vld [vmem:[%s1333_s1] sm:$0xff] (!%p189_p3)  ;;  %v360_v1 = vld [vmem:[%s1333_s1 + $0x8] sm:$0xff] (!%p189_p3)  ;;  %v361_v2 = vld [vmem:[%s1333_s1 + $0x10] sm:$0xff] (!%p189_p3)  ;;  %s888_s22 = sshll.u32 (!%p189_p3), %s1109_s12, 5 }
   0x7   : > { %192 = sbr.rel (%p189_p3) target bundleno = 318 (0x13e), region = 32  ;;  %v1023_v3 = vpack.c.bf16 (!%p189_p3), %v360_v1, %v359_v0  ;;  %v362_v4 = vld [vmem:[%s1333_s1 + $0x18] sm:$0xff] (!%p189_p3)  ;;  %p230_p4 = scmp.lt.s32.totalorder (!%p189_p3), %s888_s22, 63  ;;  %v363_v6 = vld [vmem:[%s1333_s1 + $0x20] sm:$0xff] (!%p189_p3)  ;;  %v364_v7 = vld [vmem:[%s1333_s1 + $0x28] sm:$0xff] (!%p189_p3) }
   0x8   : > { %v1027_v5 = vpack.c.bf16 (!%p189_p3), %v362_v4, %v361_v2  ;;  %v1031_v10 = vpack.c.bf16 (!%p189_p3), %v364_v7, %v363_v6  ;;  %v365_v11 = vld [vmem:[%s1333_s1 + $0x30] sm:$0xff] (!%p189_p3)  ;;  %v366_v12 = vld [vmem:[%s1333_s1 + $0x38] sm:$0xff] (!%p189_p3)  ;;  %v367_v14 = vld [vmem:[%s1333_s1 + $0x40] sm:$0xff] (!%p189_p3) }
   0x9   : > { %1024 = vmatprep.subr.bf16.mxu0 (!%p189_p3), %v1023_v3  ;;  %1055 = vmatprep.subr.bf16.mxu1 (!%p189_p3), %v1023_v3  ;;  %v1035_v13 = vpack.c.bf16 (!%p189_p3), %v366_v12, %v365_v11  ;;  %v368_v15 = vld [vmem:[%s1333_s1 + $0x48] sm:$0xff] (!%p189_p3)  ;;  %v369_v17 = vld [vmem:[%s1333_s1 + $0x50] sm:$0xff] (!%p189_p3)  ;;  %v370_v18 = vld [vmem:[%s1333_s1 + $0x58] sm:$0xff] (!%p189_p3) }
   0xa   : > { %1026 = vmatpush3.bf16.xpose.msra.mxu0 (!%p189_p3), %v1023_v3  ;;  %1063 = vmatpush3.bf16.xpose.msra.mxu1 (!%p189_p3), %v1023_v3  ;;  %v1039_v16 = vpack.c.bf16 (!%p189_p3), %v368_v15, %v367_v14  ;;  %v1043_v19 = vpack.c.bf16 (!%p189_p3), %v370_v18, %v369_v17  ;;  %v371_v20 = vld [vmem:[%s1333_s1 + $0x60] sm:$0xff] (!%p189_p3)  ;;  %v372_v21 = vld [vmem:[%s1333_s1 + $0x68] sm:$0xff] (!%p189_p3)  ;;  %v373_v23 = vld [vmem:[%s1333_s1 + $0x70] sm:$0xff] (!%p189_p3) }
   0xb   : > { %1028 = vmatprep.subr.bf16.mxu0 (!%p189_p3), %v1027_v5  ;;  %1056 = vmatprep.subr.bf16.mxu1 (!%p189_p3), %v1027_v5  ;;  %v1047_v22 = vpack.c.bf16 (!%p189_p3), %v372_v21, %v371_v20  ;;  %v374_v24 = vld [vmem:[%s1333_s1 + $0x78] sm:$0xff] (!%p189_p3)  ;;  %v1250_v56 = vld [vmem:[%s1334_s2] ss:$0 sm:$0xff] (!%p189_p3) }
   0xc   : > { %v1051_v25 = vpack.c.bf16 (!%p189_p3), %v374_v24, %v373_v23 }
   0xe   : > { %s1341_s22 = smov (!%p230_p4, %s888_s22), 63 }
   0xf   : > { %s889_s25 = sshll.u32 %s1341_s22, 3 }
  0x10   : > { %s1183_s5 = scalar_lea.vmem %s1332_s0, %s889_s25  ;;  %s1257_s9 = scalar_lea.vmem %s1335_s3, %s889_s25 }
  0x11   : > { %v327_v8 = vld [vmem:[%s1183_s5] sm:$0xff]  ;;  %v328_v26 = vld [vmem:[%s1183_s5 + $0x8] sm:$0xff]  ;;  %v329_v28 = vld [vmem:[%s1183_s5 + $0x10] sm:$0xff] }
  0x12   : > { %v343_v9 = vld [vmem:[%s1183_s5 + $0x80] sm:$0xff]  ;;  %975 = vmatprep.mubr.f32.mxu0 %v327_v8  ;;  %1030 = vmatpush3.bf16.xpose.msra.mxu0 %v1027_v5  ;;  %v344_v27 = vld [vmem:[%s1183_s5 + $0x88] sm:$0xff]  ;;  %v345_v29 = vld [vmem:[%s1183_s5 + $0x90] sm:$0xff] }
  0x13   : > { %999 = vmatprep.mubr.f32.mxu1 %v343_v9  ;;  %1064 = vmatpush3.bf16.xpose.msra.mxu1 %v1027_v5  ;;  %v330_v30 = vld [vmem:[%s1183_s5 + $0x18] sm:$0xff]  ;;  %v331_v32 = vld [vmem:[%s1183_s5 + $0x20] sm:$0xff]  ;;  %v332_v34 = vld [vmem:[%s1183_s5 + $0x28] sm:$0xff] }
  0x14   : > { %1032 = vmatprep.subr.bf16.mxu0 %v1031_v10  ;;  %1057 = vmatprep.subr.bf16.mxu1 %v1031_v10  ;;  %v346_v31 = vld [vmem:[%s1183_s5 + $0x98] sm:$0xff]  ;;  %v347_v33 = vld [vmem:[%s1183_s5 + $0xa0] sm:$0xff]  ;;  %v348_v35 = vld [vmem:[%s1183_s5 + $0xa8] sm:$0xff] }
  0x15   : > { %v333_v36 = vld [vmem:[%s1183_s5 + $0x30] sm:$0xff]  ;;  %v334_v38 = vld [vmem:[%s1183_s5 + $0x38] sm:$0xff]  ;;  %v335_v40 = vld [vmem:[%s1183_s5 + $0x40] sm:$0xff] }
  0x16   : > { %v349_v37 = vld [vmem:[%s1183_s5 + $0xb0] sm:$0xff]  ;;  %v350_v39 = vld [vmem:[%s1183_s5 + $0xb8] sm:$0xff]  ;;  %v351_v41 = vld [vmem:[%s1183_s5 + $0xc0] sm:$0xff] }
  0x17   : > { %v336_v42 = vld [vmem:[%s1183_s5 + $0x48] sm:$0xff]  ;;  %v337_v44 = vld [vmem:[%s1183_s5 + $0x50] sm:$0xff]  ;;  %v338_v46 = vld [vmem:[%s1183_s5 + $0x58] sm:$0xff] }
  0x18   : > { %v352_v43 = vld [vmem:[%s1183_s5 + $0xc8] sm:$0xff]  ;;  %v353_v45 = vld [vmem:[%s1183_s5 + $0xd0] sm:$0xff]  ;;  %v354_v47 = vld [vmem:[%s1183_s5 + $0xd8] sm:$0xff] }
  0x19   : > { %v339_v48 = vld [vmem:[%s1183_s5 + $0x60] sm:$0xff]  ;;  %v340_v50 = vld [vmem:[%s1183_s5 + $0x68] sm:$0xff]  ;;  %v341_v52 = vld [vmem:[%s1183_s5 + $0x70] sm:$0xff] }
  0x1a   : > { %1034 = vmatpush3.bf16.xpose.msra.mxu0 %v1031_v10  ;;  %v355_v49 = vld [vmem:[%s1183_s5 + $0xe0] sm:$0xff]  ;;  %v356_v51 = vld [vmem:[%s1183_s5 + $0xe8] sm:$0xff]  ;;  %v357_v53 = vld [vmem:[%s1183_s5 + $0xf0] sm:$0xff] }
  0x1b   : > { %1065 = vmatpush3.bf16.xpose.msra.mxu1 %v1031_v10  ;;  %1036 = vmatprep.subr.bf16.mxu0 %v1035_v13  ;;  %v342_v54 = vld [vmem:[%s1183_s5 + $0x78] sm:$0xff] }
  0x1c   : > { %1058 = vmatprep.subr.bf16.mxu1 %v1035_v13  ;;  %v358_v55 = vld [vmem:[%s1183_s5 + $0xf8] sm:$0xff] }
  0x22   : > { %1038 = vmatpush3.bf16.xpose.msra.mxu0 %v1035_v13 }
  0x23   : > { %1066 = vmatpush3.bf16.xpose.msra.mxu1 %v1035_v13  ;;  %1040 = vmatprep.subr.bf16.mxu0 %v1039_v16 }
  0x24   : > { %1059 = vmatprep.subr.bf16.mxu1 %v1039_v16 }
  0x2a   : > { %1042 = vmatpush3.bf16.xpose.msra.mxu0 %v1039_v16 }
  0x2b   : > { %1067 = vmatpush3.bf16.xpose.msra.mxu1 %v1039_v16  ;;  %1044 = vmatprep.subr.bf16.mxu0 %v1043_v19 }
  0x2c   : > { %1060 = vmatprep.subr.bf16.mxu1 %v1043_v19 }
  0x32   : > { %1046 = vmatpush3.bf16.xpose.msra.mxu0 %v1043_v19 }
  0x33   : > { %1068 = vmatpush3.bf16.xpose.msra.mxu1 %v1043_v19  ;;  %1048 = vmatprep.subr.bf16.mxu0 %v1047_v22 }
  0x34   : > { %1061 = vmatprep.subr.bf16.mxu1 %v1047_v22 }
  0x3a   : > { %1050 = vmatpush3.bf16.xpose.msra.mxu0 %v1047_v22 }
  0x3b   : > { %1069 = vmatpush3.bf16.xpose.msra.mxu1 %v1047_v22  ;;  %1052 = vmatprep.subr.bf16.mxu0 %v1051_v25 }
  0x3c   : > { %1062 = vmatprep.subr.bf16.mxu1 %v1051_v25 }
  0x42   : > { %1054 = vmatpush3.bf16.xpose.msra.mxu0 %v1051_v25 }
  0x43   : > { %1070 = vmatpush3.bf16.xpose.msra.mxu1 %v1051_v25 }
  0x49   : > { %976 = vmatmul.mubr.f32.vlgmr.msra.gmra.mrb[0].mxu0 %v328_v26 }
  0x4a   : > { %1000 = vmatmul.mubr.f32.vlgmr.msra.gmra.mrb[0].mxu1 %v344_v27  ;;  %978 = vmatprep.mubr.f32.mxu0 %v329_v28 }
  0x4b   : > { %1002 = vmatprep.mubr.f32.mxu1 %v345_v29 }
  0x4d   : > { %979 = vmatmul.mubr.f32.gmra.mrb[2].mxu0 %v330_v30 }
  0x4e   : > { %1003 = vmatmul.mubr.f32.gmra.mrb[2].mxu1 %v346_v31  ;;  %981 = vmatprep.mubr.f32.mxu0 %v331_v32 }
  0x4f   : > { %1005 = vmatprep.mubr.f32.mxu1 %v347_v33 }
  0x51   : > { %982 = vmatmul.mubr.f32.gmra.mrb[4].mxu0 %v332_v34 }
  0x52   : > { %1006 = vmatmul.mubr.f32.gmra.mrb[4].mxu1 %v348_v35  ;;  %984 = vmatprep.mubr.f32.mxu0 %v333_v36 }
  0x53   : > { %1008 = vmatprep.mubr.f32.mxu1 %v349_v37 }
  0x55   : > { %985 = vmatmul.mubr.f32.gmra.mrb[6].mxu0 %v334_v38 }
  0x56   : > { %1009 = vmatmul.mubr.f32.gmra.mrb[6].mxu1 %v350_v39  ;;  %987 = vmatprep.mubr.f32.mxu0 %v335_v40 }
  0x57   : > { %1011 = vmatprep.mubr.f32.mxu1 %v351_v41 }
  0x59   : > { %988 = vmatmul.mubr.f32.gmra.mrb[8].mxu0 %v336_v42 }
  0x5a   : > { %1012 = vmatmul.mubr.f32.gmra.mrb[8].mxu1 %v352_v43  ;;  %990 = vmatprep.mubr.f32.mxu0 %v337_v44 }
  0x5b   : > { %1014 = vmatprep.mubr.f32.mxu1 %v353_v45 }
  0x5d   : > { %991 = vmatmul.mubr.f32.gmra.mrb[10].mxu0 %v338_v46 }
  0x5e   : > { %1015 = vmatmul.mubr.f32.gmra.mrb[10].mxu1 %v354_v47  ;;  %993 = vmatprep.mubr.f32.mxu0 %v339_v48 }
  0x5f   : > { %1017 = vmatprep.mubr.f32.mxu1 %v355_v49 }
  0x61   : > { %994 = vmatmul.mubr.f32.gmra.mrb[12].mxu0 %v340_v50 }
  0x62   : > { %1018 = vmatmul.mubr.f32.gmra.mrb[12].mxu1 %v356_v51  ;;  %996 = vmatprep.mubr.f32.mxu0 %v341_v52 }
  0x63   : > { %1020 = vmatprep.mubr.f32.mxu1 %v357_v53 }
  0x65   : > { %997 = vmatmul.mubr.f32.gmra.mrb[14].mxu0 %v342_v54 }
  0x66   : > { %1021 = vmatmul.mubr.f32.gmra.mrb[14].mxu1 %v358_v55 }
 0x11c   : > { %v977_v57 = vpop.f32.mrb[0].mxu0 }
 0x11d   : > { %v1001_v58 = vpop.f32.mrb[0].mxu1  ;;  %v707_v59 = vadd.f32 %v977_v57, %v1250_v56  ;;  %v441_v61 = vpop.f32.mrb[1].mxu0 }
 0x11e   : > { %v723_v60 = vadd.f32 %v1001_v58, %v1250_v56  ;;  %v521_v62 = vpop.f32.mrb[1].mxu1  ;;  %v706_v63 = vadd.f32 %v1250_v56, %v441_v61 }
 0x11f   : > { %v722_v0 = vadd.f32 %v1250_v56, %v521_v62  ;;  %739 = vst [vmem:[%s1257_s9 + $0x8] sm:$0xff] %v707_v59 }
 0x120   : > { %755 = vst [vmem:[%s1257_s9 + $0x88] sm:$0xff] %v723_v60  ;;  %738 = vst [vmem:[%s1257_s9] sm:$0xff] %v706_v63  ;;  %v980_v1 = vpop.f32.mrb[2].mxu0 }
 0x121   : > { %754 = vst [vmem:[%s1257_s9 + $0x80] sm:$0xff] %v722_v0  ;;  %v1004_v2 = vpop.f32.mrb[2].mxu1  ;;  %v709_v3 = vadd.f32 %v980_v1, %v1250_v56  ;;  %v451_v5 = vpop.f32.mrb[3].mxu0 }
 0x122   : > { %v725_v4 = vadd.f32 %v1004_v2, %v1250_v56  ;;  %v531_v6 = vpop.f32.mrb[3].mxu1  ;;  %v708_v7 = vadd.f32 %v1250_v56, %v451_v5 }
 0x123   : > { %v724_v8 = vadd.f32 %v1250_v56, %v531_v6  ;;  %741 = vst [vmem:[%s1257_s9 + $0x18] sm:$0xff] %v709_v3 }
 0x124   : > { %757 = vst [vmem:[%s1257_s9 + $0x98] sm:$0xff] %v725_v4  ;;  %740 = vst [vmem:[%s1257_s9 + $0x10] sm:$0xff] %v708_v7  ;;  %v983_v9 = vpop.f32.mrb[4].mxu0 }
 0x125   : > { %756 = vst [vmem:[%s1257_s9 + $0x90] sm:$0xff] %v724_v8  ;;  %v1007_v10 = vpop.f32.mrb[4].mxu1  ;;  %v711_v11 = vadd.f32 %v983_v9, %v1250_v56  ;;  %v461_v13 = vpop.f32.mrb[5].mxu0 }
 0x126   : > { %v727_v12 = vadd.f32 %v1007_v10, %v1250_v56  ;;  %v541_v14 = vpop.f32.mrb[5].mxu1  ;;  %v710_v15 = vadd.f32 %v1250_v56, %v461_v13 }
 0x127   : > { %v726_v16 = vadd.f32 %v1250_v56, %v541_v14  ;;  %743 = vst [vmem:[%s1257_s9 + $0x28] sm:$0xff] %v711_v11 }
 0x128   : > { %759 = vst [vmem:[%s1257_s9 + $0xa8] sm:$0xff] %v727_v12  ;;  %742 = vst [vmem:[%s1257_s9 + $0x20] sm:$0xff] %v710_v15  ;;  %v986_v17 = vpop.f32.mrb[6].mxu0 }
 0x129   : > { %758 = vst [vmem:[%s1257_s9 + $0xa0] sm:$0xff] %v726_v16  ;;  %v1010_v18 = vpop.f32.mrb[6].mxu1  ;;  %v713_v19 = vadd.f32 %v986_v17, %v1250_v56  ;;  %v471_v21 = vpop.f32.mrb[7].mxu0 }
 0x12a   : > { %v729_v20 = vadd.f32 %v1010_v18, %v1250_v56  ;;  %v551_v22 = vpop.f32.mrb[7].mxu1  ;;  %v712_v23 = vadd.f32 %v1250_v56, %v471_v21 }
 0x12b   : > { %v728_v24 = vadd.f32 %v1250_v56, %v551_v22  ;;  %745 = vst [vmem:[%s1257_s9 + $0x38] sm:$0xff] %v713_v19 }
 0x12c   : > { %761 = vst [vmem:[%s1257_s9 + $0xb8] sm:$0xff] %v729_v20  ;;  %744 = vst [vmem:[%s1257_s9 + $0x30] sm:$0xff] %v712_v23  ;;  %v989_v25 = vpop.f32.mrb[8].mxu0 }
 0x12d   : > { %760 = vst [vmem:[%s1257_s9 + $0xb0] sm:$0xff] %v728_v24  ;;  %v1013_v26 = vpop.f32.mrb[8].mxu1  ;;  %v715_v27 = vadd.f32 %v989_v25, %v1250_v56  ;;  %v481_v29 = vpop.f32.mrb[9].mxu0 }
 0x12e   : > { %v731_v28 = vadd.f32 %v1013_v26, %v1250_v56  ;;  %v561_v30 = vpop.f32.mrb[9].mxu1  ;;  %v714_v31 = vadd.f32 %v1250_v56, %v481_v29 }
 0x12f   : > { %v730_v32 = vadd.f32 %v1250_v56, %v561_v30  ;;  %747 = vst [vmem:[%s1257_s9 + $0x48] sm:$0xff] %v715_v27 }
 0x130   : > { %763 = vst [vmem:[%s1257_s9 + $0xc8] sm:$0xff] %v731_v28  ;;  %746 = vst [vmem:[%s1257_s9 + $0x40] sm:$0xff] %v714_v31  ;;  %v992_v33 = vpop.f32.mrb[10].mxu0 }
 0x131   : > { %762 = vst [vmem:[%s1257_s9 + $0xc0] sm:$0xff] %v730_v32  ;;  %v1016_v34 = vpop.f32.mrb[10].mxu1  ;;  %v717_v35 = vadd.f32 %v992_v33, %v1250_v56  ;;  %v491_v37 = vpop.f32.mrb[11].mxu0 }
 0x132   : > { %v733_v36 = vadd.f32 %v1016_v34, %v1250_v56  ;;  %v571_v38 = vpop.f32.mrb[11].mxu1  ;;  %v716_v39 = vadd.f32 %v1250_v56, %v491_v37 }
 0x133   : > { %v732_v40 = vadd.f32 %v1250_v56, %v571_v38  ;;  %749 = vst [vmem:[%s1257_s9 + $0x58] sm:$0xff] %v717_v35 }
 0x134   : > { %765 = vst [vmem:[%s1257_s9 + $0xd8] sm:$0xff] %v733_v36  ;;  %748 = vst [vmem:[%s1257_s9 + $0x50] sm:$0xff] %v716_v39  ;;  %v995_v41 = vpop.f32.mrb[12].mxu0 }
 0x135   : > { %764 = vst [vmem:[%s1257_s9 + $0xd0] sm:$0xff] %v732_v40  ;;  %v1019_v42 = vpop.f32.mrb[12].mxu1  ;;  %v719_v43 = vadd.f32 %v995_v41, %v1250_v56  ;;  %v501_v45 = vpop.f32.mrb[13].mxu0 }
 0x136   : > { %v735_v44 = vadd.f32 %v1019_v42, %v1250_v56  ;;  %v581_v46 = vpop.f32.mrb[13].mxu1  ;;  %v718_v47 = vadd.f32 %v1250_v56, %v501_v45 }
 0x137   : > { %v734_v48 = vadd.f32 %v1250_v56, %v581_v46  ;;  %751 = vst [vmem:[%s1257_s9 + $0x68] sm:$0xff] %v719_v43 }
 0x138   : > { %767 = vst [vmem:[%s1257_s9 + $0xe8] sm:$0xff] %v735_v44  ;;  %750 = vst [vmem:[%s1257_s9 + $0x60] sm:$0xff] %v718_v47  ;;  %v998_v49 = vpop.f32.mrb[14].mxu0 }
 0x139   : > { %766 = vst [vmem:[%s1257_s9 + $0xe0] sm:$0xff] %v734_v48  ;;  %v1022_v50 = vpop.f32.mrb[14].mxu1  ;;  %v721_v51 = vadd.f32 %v998_v49, %v1250_v56  ;;  %v511_v53 = vpop.f32.mrb[15].mxu0 }
 0x13a   : > { %v737_v52 = vadd.f32 %v1022_v50, %v1250_v56  ;;  %v591_v54 = vpop.f32.mrb[15].mxu1  ;;  %v720_v55 = vadd.f32 %v1250_v56, %v511_v53 }
 0x13b   : > { %v736_v57 = vadd.f32 %v1250_v56, %v591_v54  ;;  %753 = vst [vmem:[%s1257_s9 + $0x78] sm:$0xff] %v721_v51 }
 0x13c   : > { %769 = vst [vmem:[%s1257_s9 + $0xf8] sm:$0xff] %v737_v52  ;;  %752 = vst [vmem:[%s1257_s9 + $0x70] sm:$0xff] %v720_v55 }
 0x13d   : > { %768 = vst [vmem:[%s1257_s9 + $0xf0] sm:$0xff] %v736_v57 }
 0x13e PF: > { %s13_s14 = sadd.s32 1, %s1117_s14   ;;  %s1336_s12 = smov %s1113_s13 }
 0x13f   : > { %p10_p5 = scmp.ge.s32.totalorder %s13_s14, 4   ;;  %s1337_s13 = smov %s1339_s15 }
 0x141   :  { %12 = sbr.rel (!%p10_p5) target bundleno = 2 (0x2), region = 76 }

</bundles_post_ra>
